<compile_context>
chip_gen: v7x
topology: tpu7x:2x2x1
jax: 0.10.0
libtpu: 0.0.40
codegen_flags: <defaults>
</compile_context>

<pallas_src>
import functools
import math

import jax
import jax.numpy as jnp
from jax.experimental import pallas as pl
from jax.experimental.pallas import tpu as pltpu


def _lstm_pinn_kernel(x_ref, wproj_ref, wrec_ref, ball_ref, wfc_ref, bfc_ref,
                      out_ref, *, seq_len, batch, hidden):
    T, B, H = seq_len, batch, hidden
    H2 = 2 * H

    b_all = ball_ref[...]                                   # (1, 8H) fused biases, 0.5-scaled i/f/o

    # One batched MXU matmul for ALL non-recurrent additive terms of both layers:
    # layer-0 gate columns get x[t] @ Wih0 + b0, layer-1 columns get just b1
    # (layer-1's real input term h0 @ Wih1 lives inside W_rec on the wavefront).
    proj = (jnp.dot(x_ref[...], wproj_ref[...],
                    preferred_element_type=jnp.float32) + b_all)   # (T*B, 8H)

    w_rec = wrec_ref[...]                                    # (2H, 8H)

    def cell(gates, c_prev):
        # Gate columns are interleaved [i0 i1 | f0 f1 | o0 o1 | g0 g1]; i/f/o
        # pre-activations were halved at pack time, so ONE tanh over all 8H
        # lanes activates every gate of both layers.
        a = jnp.tanh(gates)
        i = 0.5 * a[:, 0 * H2:1 * H2] + 0.5
        f = 0.5 * a[:, 1 * H2:2 * H2] + 0.5
        o = 0.5 * a[:, 2 * H2:3 * H2] + 0.5
        g = a[:, 3 * H2:4 * H2]
        c_new = f * c_prev + i * g                           # (B, 2H) = [layer0 | layer1]
        h_new = o * jnp.tanh(c_new)
        return h_new, c_new

    # ---- wavefront step 0: layer-0 @ t=0 only (states are zero => gates = proj[0]) ----
    c_zero = jnp.zeros((B, H2), jnp.float32)
    h_state, c_state = cell(proj[0:B, :], c_zero)
    lane = jax.lax.broadcasted_iota(jnp.int32, (B, H2), 1)
    keep_l0 = lane < H                                       # layer-1 hasn't run yet: keep its state at 0
    h_state = jnp.where(keep_l0, h_state, 0.0)
    c_state = jnp.where(keep_l0, c_state, 0.0)

    # ---- wavefront steps 1..T-1: ONE fused MXU matmul per step computes layer-0
    # gates for t=s and layer-1 gates for t=s-1.  T is small -> statically unrolled.
    # TODO(synk): switch to lax.fori_loop(unroll=True) with pl.ds-indexed proj if T grows.
    for s in range(1, T):
        gates = (jnp.dot(h_state, w_rec, preferred_element_type=jnp.float32)
                 + proj[s * B:(s + 1) * B, :])
        h_state, c_state = cell(gates, c_state)

    # ---- wavefront step T: layer-1 @ t=T-1 (the layer-0 half of this update is
    # computed but never read, so it is harmlessly discarded). ----
    gates = jnp.dot(h_state, w_rec, preferred_element_type=jnp.float32) + b_all
    h_state, _ = cell(gates, c_state)

    # fc(out[:, -1, :]) on layer-1's final hidden state.
    h1_last = h_state[:, H:H2]
    out_ref[...] = (jnp.dot(h1_last, wfc_ref[...], preferred_element_type=jnp.float32)
                    + bfc_ref[...])


def init_params(key, input_size, hidden_size, output_size):
    """Raw PyTorch-layout parameters: uniform(-1/sqrt(H), 1/sqrt(H))."""
    H = hidden_size
    stdv = 1.0 / math.sqrt(H)
    ks = jax.random.split(key, 10)
    u = lambda k, shape: jax.random.uniform(k, shape, jnp.float32, -stdv, stdv)
    return dict(
        w_ih_l0=u(ks[0], (4 * H, input_size)),   # gate order [i, f, g, o]
        w_hh_l0=u(ks[1], (4 * H, H)),
        b_ih_l0=u(ks[2], (4 * H,)),
        b_hh_l0=u(ks[3], (4 * H,)),
        w_ih_l1=u(ks[4], (4 * H, H)),
        w_hh_l1=u(ks[5], (4 * H, H)),
        b_ih_l1=u(ks[6], (4 * H,)),
        b_hh_l1=u(ks[7], (4 * H,)),
        w_fc=u(ks[8], (output_size, H)),
        b_fc=u(ks[9], (output_size,)),
    )


def _blocks_t(w, H):
    """Split a PyTorch (4H, in) weight into transposed per-gate blocks (in, H),
    returned in PyTorch's [i, f, g, o] order."""
    return (w[0 * H:1 * H].T, w[1 * H:2 * H].T, w[2 * H:3 * H].T, w[3 * H:4 * H].T)


def pack_params(raw, hidden_size):
    """Wavefront packing.

    Fused gate-column layout (blocks of H): [i0 i1 | f0 f1 | o0 o1 | g0 g1], so the
    concatenated (B, 2H) state [layer0 | layer1] updates with plain contiguous slices.
    i/f/o columns (weights AND biases) are pre-scaled by 0.5 so sigmoid(z) is
    recovered as 0.5 * tanh(z/2) + 0.5 from a single tanh over all 8H gate lanes.
    """
    H = hidden_size
    D = raw["w_ih_l0"].shape[1]
    O = raw["w_fc"].shape[0]
    s = 0.5

    i0x, f0x, g0x, o0x = _blocks_t(raw["w_ih_l0"], H)       # (D, H) each
    i0h, f0h, g0h, o0h = _blocks_t(raw["w_hh_l0"], H)       # (H, H)
    i1x, f1x, g1x, o1x = _blocks_t(raw["w_ih_l1"], H)       # (H, H)  (layer-1 input = h0)
    i1h, f1h, g1h, o1h = _blocks_t(raw["w_hh_l1"], H)       # (H, H)

    zD = jnp.zeros((D, H), jnp.float32)
    zH = jnp.zeros((H, H), jnp.float32)

    # Non-recurrent projection weight (only layer-0's gates depend on x): (D, 8H)
    w_proj = jnp.concatenate(
        [s * i0x, zD, s * f0x, zD, s * o0x, zD, g0x, zD], axis=1)

    # Fused recurrent weight, rows = [h0 | h1]: (2H, 8H)
    w_rec = jnp.concatenate([
        jnp.concatenate([s * i0h, s * i1x, s * f0h, s * f1x,
                         s * o0h, s * o1x, g0h, g1x], axis=1),
        jnp.concatenate([zH, s * i1h, zH, s * f1h,
                         zH, s * o1h, zH, g1h], axis=1),
    ], axis=0)

    b0 = raw["b_ih_l0"] + raw["b_hh_l0"]
    b1 = raw["b_ih_l1"] + raw["b_hh_l1"]
    bi0, bf0, bg0, bo0 = b0[0:H], b0[H:2 * H], b0[2 * H:3 * H], b0[3 * H:4 * H]
    bi1, bf1, bg1, bo1 = b1[0:H], b1[H:2 * H], b1[2 * H:3 * H], b1[3 * H:4 * H]
    b_all = jnp.concatenate(
        [s * bi0, s * bi1, s * bf0, s * bf1, s * bo0, s * bo1, bg0, bg1]
    ).reshape(1, 8 * H)

    return dict(
        w_proj=w_proj,                       # (D, 8H)
        w_rec=w_rec,                         # (2H, 8H)
        b_all=b_all,                         # (1, 8H)
        w_fc_t=raw["w_fc"].T,                # (H, O)
        b_fc=raw["b_fc"].reshape(1, O),      # (1, O)
    )


def lstm_pinn_forward(x, packed):
    """x: (B, T, D) float32 — same convention as the PyTorch module (batch_first)."""
    B, T, D = x.shape
    H = packed["w_rec"].shape[0] // 2
    O = packed["w_fc_t"].shape[1]

    # Time-major rows: row t*B + b holds sample b at timestep t.
    x_flat = jnp.transpose(x, (1, 0, 2)).reshape(T * B, D)

    vmem = pl.BlockSpec(memory_space=pltpu.MemorySpace.VMEM)
    return pl.pallas_call(
        functools.partial(_lstm_pinn_kernel, seq_len=T, batch=B, hidden=H),
        out_shape=jax.ShapeDtypeStruct((B, O), jnp.float32),
        in_specs=[vmem] * 6,
        out_specs=vmem,
    )(x_flat, packed["w_proj"], packed["w_rec"], packed["b_all"],
      packed["w_fc_t"], packed["b_fc"])


def lstm_pinn_reference(x, raw):
    """Pure-JAX reference using RAW PyTorch-layout weights and [i,f,g,o] order."""
    B, T, D = x.shape
    H = raw["w_hh_l0"].shape[1]

    def cell(x_t, h, c, w_ih, w_hh, b_ih, b_hh):
        gates = x_t @ w_ih.T + b_ih + h @ w_hh.T + b_hh
        i = jax.nn.sigmoid(gates[:, 0 * H:1 * H])
        f = jax.nn.sigmoid(gates[:, 1 * H:2 * H])
        g = jnp.tanh(gates[:, 2 * H:3 * H])
        o = jax.nn.sigmoid(gates[:, 3 * H:4 * H])
        c_new = f * c + i * g
        return o * jnp.tanh(c_new), c_new

    h0 = c0 = h1 = c1 = jnp.zeros((B, H), jnp.float32)
    for t in range(T):
        h0, c0 = cell(x[:, t, :], h0, c0,
                      raw["w_ih_l0"], raw["w_hh_l0"], raw["b_ih_l0"], raw["b_hh_l0"])
        h1, c1 = cell(h0, h1, c1,
                      raw["w_ih_l1"], raw["w_hh_l1"], raw["b_ih_l1"], raw["b_hh_l1"])
    return h1 @ raw["w_fc"].T + raw["b_fc"]


if __name__ == "__main__":
    # Small shapes consistent with the module: x is (batch, seq, input_size).
    B, T, D, H, O = 2, 8, 16, 32, 4

    key = jax.random.PRNGKey(0)
    k_x, k_p = jax.random.split(key)
    x = jax.random.normal(k_x, (B, T, D), jnp.float32)
    raw = init_params(k_p, D, H, O)
    packed = pack_params(raw, H)

    out = jax.block_until_ready(lstm_pinn_forward(x, packed))
    ref = lstm_pinn_reference(x, raw)

    assert out.shape == (B, O)
    assert jnp.allclose(out, ref, atol=2e-5, rtol=2e-5), "Pallas kernel mismatch vs reference"

    print("KERNEL_OK")
</pallas_src>

<mosaic_0001>
module attributes {stable_mosaic.version = 11 : i64} {
  func.func @_lstm_pinn_kernel(%arg0: memref<16x16xf32, #tpu.memory_space<vmem>>, %arg1: memref<16x256xf32, #tpu.memory_space<vmem>>, %arg2: memref<64x256xf32, #tpu.memory_space<vmem>>, %arg3: memref<1x256xf32, #tpu.memory_space<vmem>>, %arg4: memref<32x4xf32, #tpu.memory_space<vmem>>, %arg5: memref<1x4xf32, #tpu.memory_space<vmem>>, %arg6: memref<2x4xf32, #tpu.memory_space<vmem>>) attributes {dimension_semantics = [], scalar_prefetch = 0 : i64, scratch_operands = 0 : i64, tpu.core_type = #tpu.core_type<tc>} {
    %c0 = arith.constant 0 : index
    %c0_0 = arith.constant 0 : index
    %0 = vector.load %arg3[%c0, %c0_0] : memref<1x256xf32, #tpu.memory_space<vmem>>, vector<1x256xf32>
    %c0_1 = arith.constant 0 : index
    %c0_2 = arith.constant 0 : index
    %1 = vector.load %arg0[%c0_1, %c0_2] : memref<16x16xf32, #tpu.memory_space<vmem>>, vector<16x16xf32>
    %c0_3 = arith.constant 0 : index
    %c0_4 = arith.constant 0 : index
    %2 = vector.load %arg1[%c0_3, %c0_4] : memref<16x256xf32, #tpu.memory_space<vmem>>, vector<16x256xf32>
    %cst = arith.constant dense<0.000000e+00> : vector<16x256xf32>
    %3 = tpu.matmul %1, %2, %cst {dimension_numbers = #tpu.dot_dimension_numbers<[1], [0], [0], [1], [0, 0, 1, 1], [], []>} : vector<16x16xf32>, vector<16x256xf32>, vector<16x256xf32> -> vector<16x256xf32>
    %4 = vector.broadcast %0 : vector<1x256xf32> to vector<16x256xf32>
    %5 = arith.addf %3, %4 : vector<16x256xf32>
    %c0_5 = arith.constant 0 : index
    %c0_6 = arith.constant 0 : index
    %6 = vector.load %arg2[%c0_5, %c0_6] : memref<64x256xf32, #tpu.memory_space<vmem>>, vector<64x256xf32>
    %cst_7 = arith.constant 0.000000e+00 : f32
    %7 = vector.broadcast %cst_7 : f32 to vector<2x64xf32>
    %8 = vector.extract_strided_slice %5 {offsets = [0, 0], sizes = [2, 256], strides = [1, 1]} : vector<16x256xf32> to vector<2x256xf32>
    %9 = math.tanh %8 : vector<2x256xf32>
    %10 = vector.extract_strided_slice %9 {offsets = [0, 0], sizes = [2, 64], strides = [1, 1]} : vector<2x256xf32> to vector<2x64xf32>
    %cst_8 = arith.constant 5.000000e-01 : f32
    %11 = vector.broadcast %cst_8 : f32 to vector<2x64xf32>
    %12 = arith.mulf %11, %10 : vector<2x64xf32>
    %cst_9 = arith.constant 5.000000e-01 : f32
    %13 = vector.broadcast %cst_9 : f32 to vector<2x64xf32>
    %14 = arith.addf %12, %13 : vector<2x64xf32>
    %15 = vector.extract_strided_slice %9 {offsets = [0, 64], sizes = [2, 64], strides = [1, 1]} : vector<2x256xf32> to vector<2x64xf32>
    %cst_10 = arith.constant 5.000000e-01 : f32
    %16 = vector.broadcast %cst_10 : f32 to vector<2x64xf32>
    %17 = arith.mulf %16, %15 : vector<2x64xf32>
    %cst_11 = arith.constant 5.000000e-01 : f32
    %18 = vector.broadcast %cst_11 : f32 to vector<2x64xf32>
    %19 = arith.addf %17, %18 : vector<2x64xf32>
    %20 = vector.extract_strided_slice %9 {offsets = [0, 128], sizes = [2, 64], strides = [1, 1]} : vector<2x256xf32> to vector<2x64xf32>
    %cst_12 = arith.constant 5.000000e-01 : f32
    %21 = vector.broadcast %cst_12 : f32 to vector<2x64xf32>
    %22 = arith.mulf %21, %20 : vector<2x64xf32>
    %cst_13 = arith.constant 5.000000e-01 : f32
    %23 = vector.broadcast %cst_13 : f32 to vector<2x64xf32>
    %24 = arith.addf %22, %23 : vector<2x64xf32>
    %25 = vector.extract_strided_slice %9 {offsets = [0, 192], sizes = [2, 64], strides = [1, 1]} : vector<2x256xf32> to vector<2x64xf32>
    %26 = arith.mulf %19, %7 : vector<2x64xf32>
    %27 = arith.mulf %14, %25 : vector<2x64xf32>
    %28 = arith.addf %26, %27 : vector<2x64xf32>
    %29 = math.tanh %28 : vector<2x64xf32>
    %30 = arith.mulf %24, %29 : vector<2x64xf32>
    %31 = tpu.iota {dimensions = array<i32: 1>} : vector<2x64xi32>
    %c32_i32 = arith.constant 32 : i32
    %32 = vector.broadcast %c32_i32 : i32 to vector<2x64xi32>
    %33 = arith.cmpi slt, %31, %32 : vector<2x64xi32>
    %cst_14 = arith.constant 0.000000e+00 : f32
    %34 = vector.broadcast %cst_14 : f32 to vector<2x64xf32>
    %35 = arith.select %33, %30, %34 : vector<2x64xi1>, vector<2x64xf32>
    %cst_15 = arith.constant 0.000000e+00 : f32
    %36 = vector.broadcast %cst_15 : f32 to vector<2x64xf32>
    %37 = arith.select %33, %28, %36 : vector<2x64xi1>, vector<2x64xf32>
    %cst_16 = arith.constant dense<0.000000e+00> : vector<2x256xf32>
    %38 = tpu.matmul %35, %6, %cst_16 {dimension_numbers = #tpu.dot_dimension_numbers<[1], [0], [0], [1], [0, 0, 1, 1], [], []>} : vector<2x64xf32>, vector<64x256xf32>, vector<2x256xf32> -> vector<2x256xf32>
    %39 = vector.extract_strided_slice %5 {offsets = [2, 0], sizes = [2, 256], strides = [1, 1]} : vector<16x256xf32> to vector<2x256xf32>
    %40 = arith.addf %38, %39 : vector<2x256xf32>
    %41 = math.tanh %40 : vector<2x256xf32>
    %42 = vector.extract_strided_slice %41 {offsets = [0, 0], sizes = [2, 64], strides = [1, 1]} : vector<2x256xf32> to vector<2x64xf32>
    %cst_17 = arith.constant 5.000000e-01 : f32
    %43 = vector.broadcast %cst_17 : f32 to vector<2x64xf32>
    %44 = arith.mulf %43, %42 : vector<2x64xf32>
    %cst_18 = arith.constant 5.000000e-01 : f32
    %45 = vector.broadcast %cst_18 : f32 to vector<2x64xf32>
    %46 = arith.addf %44, %45 : vector<2x64xf32>
    %47 = vector.extract_strided_slice %41 {offsets = [0, 64], sizes = [2, 64], strides = [1, 1]} : vector<2x256xf32> to vector<2x64xf32>
    %cst_19 = arith.constant 5.000000e-01 : f32
    %48 = vector.broadcast %cst_19 : f32 to vector<2x64xf32>
    %49 = arith.mulf %48, %47 : vector<2x64xf32>
    %cst_20 = arith.constant 5.000000e-01 : f32
    %50 = vector.broadcast %cst_20 : f32 to vector<2x64xf32>
    %51 = arith.addf %49, %50 : vector<2x64xf32>
    %52 = vector.extract_strided_slice %41 {offsets = [0, 128], sizes = [2, 64], strides = [1, 1]} : vector<2x256xf32> to vector<2x64xf32>
    %cst_21 = arith.constant 5.000000e-01 : f32
    %53 = vector.broadcast %cst_21 : f32 to vector<2x64xf32>
    %54 = arith.mulf %53, %52 : vector<2x64xf32>
    %cst_22 = arith.constant 5.000000e-01 : f32
    %55 = vector.broadcast %cst_22 : f32 to vector<2x64xf32>
    %56 = arith.addf %54, %55 : vector<2x64xf32>
    %57 = vector.extract_strided_slice %41 {offsets = [0, 192], sizes = [2, 64], strides = [1, 1]} : vector<2x256xf32> to vector<2x64xf32>
    %58 = arith.mulf %51, %37 : vector<2x64xf32>
    %59 = arith.mulf %46, %57 : vector<2x64xf32>
    %60 = arith.addf %58, %59 : vector<2x64xf32>
    %61 = math.tanh %60 : vector<2x64xf32>
    %62 = arith.mulf %56, %61 : vector<2x64xf32>
    %cst_23 = arith.constant dense<0.000000e+00> : vector<2x256xf32>
    %63 = tpu.matmul %62, %6, %cst_23 {dimension_numbers = #tpu.dot_dimension_numbers<[1], [0], [0], [1], [0, 0, 1, 1], [], []>} : vector<2x64xf32>, vector<64x256xf32>, vector<2x256xf32> -> vector<2x256xf32>
    %64 = vector.extract_strided_slice %5 {offsets = [4, 0], sizes = [2, 256], strides = [1, 1]} : vector<16x256xf32> to vector<2x256xf32>
    %65 = arith.addf %63, %64 : vector<2x256xf32>
    %66 = math.tanh %65 : vector<2x256xf32>
    %67 = vector.extract_strided_slice %66 {offsets = [0, 0], sizes = [2, 64], strides = [1, 1]} : vector<2x256xf32> to vector<2x64xf32>
    %cst_24 = arith.constant 5.000000e-01 : f32
    %68 = vector.broadcast %cst_24 : f32 to vector<2x64xf32>
    %69 = arith.mulf %68, %67 : vector<2x64xf32>
    %cst_25 = arith.constant 5.000000e-01 : f32
    %70 = vector.broadcast %cst_25 : f32 to vector<2x64xf32>
    %71 = arith.addf %69, %70 : vector<2x64xf32>
    %72 = vector.extract_strided_slice %66 {offsets = [0, 64], sizes = [2, 64], strides = [1, 1]} : vector<2x256xf32> to vector<2x64xf32>
    %cst_26 = arith.constant 5.000000e-01 : f32
    %73 = vector.broadcast %cst_26 : f32 to vector<2x64xf32>
    %74 = arith.mulf %73, %72 : vector<2x64xf32>
    %cst_27 = arith.constant 5.000000e-01 : f32
    %75 = vector.broadcast %cst_27 : f32 to vector<2x64xf32>
    %76 = arith.addf %74, %75 : vector<2x64xf32>
    %77 = vector.extract_strided_slice %66 {offsets = [0, 128], sizes = [2, 64], strides = [1, 1]} : vector<2x256xf32> to vector<2x64xf32>
    %cst_28 = arith.constant 5.000000e-01 : f32
    %78 = vector.broadcast %cst_28 : f32 to vector<2x64xf32>
    %79 = arith.mulf %78, %77 : vector<2x64xf32>
    %cst_29 = arith.constant 5.000000e-01 : f32
    %80 = vector.broadcast %cst_29 : f32 to vector<2x64xf32>
    %81 = arith.addf %79, %80 : vector<2x64xf32>
    %82 = vector.extract_strided_slice %66 {offsets = [0, 192], sizes = [2, 64], strides = [1, 1]} : vector<2x256xf32> to vector<2x64xf32>
    %83 = arith.mulf %76, %60 : vector<2x64xf32>
    %84 = arith.mulf %71, %82 : vector<2x64xf32>
    %85 = arith.addf %83, %84 : vector<2x64xf32>
    %86 = math.tanh %85 : vector<2x64xf32>
    %87 = arith.mulf %81, %86 : vector<2x64xf32>
    %cst_30 = arith.constant dense<0.000000e+00> : vector<2x256xf32>
    %88 = tpu.matmul %87, %6, %cst_30 {dimension_numbers = #tpu.dot_dimension_numbers<[1], [0], [0], [1], [0, 0, 1, 1], [], []>} : vector<2x64xf32>, vector<64x256xf32>, vector<2x256xf32> -> vector<2x256xf32>
    %89 = vector.extract_strided_slice %5 {offsets = [6, 0], sizes = [2, 256], strides = [1, 1]} : vector<16x256xf32> to vector<2x256xf32>
    %90 = arith.addf %88, %89 : vector<2x256xf32>
    %91 = math.tanh %90 : vector<2x256xf32>
    %92 = vector.extract_strided_slice %91 {offsets = [0, 0], sizes = [2, 64], strides = [1, 1]} : vector<2x256xf32> to vector<2x64xf32>
    %cst_31 = arith.constant 5.000000e-01 : f32
    %93 = vector.broadcast %cst_31 : f32 to vector<2x64xf32>
    %94 = arith.mulf %93, %92 : vector<2x64xf32>
    %cst_32 = arith.constant 5.000000e-01 : f32
    %95 = vector.broadcast %cst_32 : f32 to vector<2x64xf32>
    %96 = arith.addf %94, %95 : vector<2x64xf32>
    %97 = vector.extract_strided_slice %91 {offsets = [0, 64], sizes = [2, 64], strides = [1, 1]} : vector<2x256xf32> to vector<2x64xf32>
    %cst_33 = arith.constant 5.000000e-01 : f32
    %98 = vector.broadcast %cst_33 : f32 to vector<2x64xf32>
    %99 = arith.mulf %98, %97 : vector<2x64xf32>
    %cst_34 = arith.constant 5.000000e-01 : f32
    %100 = vector.broadcast %cst_34 : f32 to vector<2x64xf32>
    %101 = arith.addf %99, %100 : vector<2x64xf32>
    %102 = vector.extract_strided_slice %91 {offsets = [0, 128], sizes = [2, 64], strides = [1, 1]} : vector<2x256xf32> to vector<2x64xf32>
    %cst_35 = arith.constant 5.000000e-01 : f32
    %103 = vector.broadcast %cst_35 : f32 to vector<2x64xf32>
    %104 = arith.mulf %103, %102 : vector<2x64xf32>
    %cst_36 = arith.constant 5.000000e-01 : f32
    %105 = vector.broadcast %cst_36 : f32 to vector<2x64xf32>
    %106 = arith.addf %104, %105 : vector<2x64xf32>
    %107 = vector.extract_strided_slice %91 {offsets = [0, 192], sizes = [2, 64], strides = [1, 1]} : vector<2x256xf32> to vector<2x64xf32>
    %108 = arith.mulf %101, %85 : vector<2x64xf32>
    %109 = arith.mulf %96, %107 : vector<2x64xf32>
    %110 = arith.addf %108, %109 : vector<2x64xf32>
    %111 = math.tanh %110 : vector<2x64xf32>
    %112 = arith.mulf %106, %111 : vector<2x64xf32>
    %cst_37 = arith.constant dense<0.000000e+00> : vector<2x256xf32>
    %113 = tpu.matmul %112, %6, %cst_37 {dimension_numbers = #tpu.dot_dimension_numbers<[1], [0], [0], [1], [0, 0, 1, 1], [], []>} : vector<2x64xf32>, vector<64x256xf32>, vector<2x256xf32> -> vector<2x256xf32>
    %114 = vector.extract_strided_slice %5 {offsets = [8, 0], sizes = [2, 256], strides = [1, 1]} : vector<16x256xf32> to vector<2x256xf32>
    %115 = arith.addf %113, %114 : vector<2x256xf32>
    %116 = math.tanh %115 : vector<2x256xf32>
    %117 = vector.extract_strided_slice %116 {offsets = [0, 0], sizes = [2, 64], strides = [1, 1]} : vector<2x256xf32> to vector<2x64xf32>
    %cst_38 = arith.constant 5.000000e-01 : f32
    %118 = vector.broadcast %cst_38 : f32 to vector<2x64xf32>
    %119 = arith.mulf %118, %117 : vector<2x64xf32>
    %cst_39 = arith.constant 5.000000e-01 : f32
    %120 = vector.broadcast %cst_39 : f32 to vector<2x64xf32>
    %121 = arith.addf %119, %120 : vector<2x64xf32>
    %122 = vector.extract_strided_slice %116 {offsets = [0, 64], sizes = [2, 64], strides = [1, 1]} : vector<2x256xf32> to vector<2x64xf32>
    %cst_40 = arith.constant 5.000000e-01 : f32
    %123 = vector.broadcast %cst_40 : f32 to vector<2x64xf32>
    %124 = arith.mulf %123, %122 : vector<2x64xf32>
    %cst_41 = arith.constant 5.000000e-01 : f32
    %125 = vector.broadcast %cst_41 : f32 to vector<2x64xf32>
    %126 = arith.addf %124, %125 : vector<2x64xf32>
    %127 = vector.extract_strided_slice %116 {offsets = [0, 128], sizes = [2, 64], strides = [1, 1]} : vector<2x256xf32> to vector<2x64xf32>
    %cst_42 = arith.constant 5.000000e-01 : f32
    %128 = vector.broadcast %cst_42 : f32 to vector<2x64xf32>
    %129 = arith.mulf %128, %127 : vector<2x64xf32>
    %cst_43 = arith.constant 5.000000e-01 : f32
    %130 = vector.broadcast %cst_43 : f32 to vector<2x64xf32>
    %131 = arith.addf %129, %130 : vector<2x64xf32>
    %132 = vector.extract_strided_slice %116 {offsets = [0, 192], sizes = [2, 64], strides = [1, 1]} : vector<2x256xf32> to vector<2x64xf32>
    %133 = arith.mulf %126, %110 : vector<2x64xf32>
    %134 = arith.mulf %121, %132 : vector<2x64xf32>
    %135 = arith.addf %133, %134 : vector<2x64xf32>
    %136 = math.tanh %135 : vector<2x64xf32>
    %137 = arith.mulf %131, %136 : vector<2x64xf32>
    %cst_44 = arith.constant dense<0.000000e+00> : vector<2x256xf32>
    %138 = tpu.matmul %137, %6, %cst_44 {dimension_numbers = #tpu.dot_dimension_numbers<[1], [0], [0], [1], [0, 0, 1, 1], [], []>} : vector<2x64xf32>, vector<64x256xf32>, vector<2x256xf32> -> vector<2x256xf32>
    %139 = vector.extract_strided_slice %5 {offsets = [10, 0], sizes = [2, 256], strides = [1, 1]} : vector<16x256xf32> to vector<2x256xf32>
    %140 = arith.addf %138, %139 : vector<2x256xf32>
    %141 = math.tanh %140 : vector<2x256xf32>
    %142 = vector.extract_strided_slice %141 {offsets = [0, 0], sizes = [2, 64], strides = [1, 1]} : vector<2x256xf32> to vector<2x64xf32>
    %cst_45 = arith.constant 5.000000e-01 : f32
    %143 = vector.broadcast %cst_45 : f32 to vector<2x64xf32>
    %144 = arith.mulf %143, %142 : vector<2x64xf32>
    %cst_46 = arith.constant 5.000000e-01 : f32
    %145 = vector.broadcast %cst_46 : f32 to vector<2x64xf32>
    %146 = arith.addf %144, %145 : vector<2x64xf32>
    %147 = vector.extract_strided_slice %141 {offsets = [0, 64], sizes = [2, 64], strides = [1, 1]} : vector<2x256xf32> to vector<2x64xf32>
    %cst_47 = arith.constant 5.000000e-01 : f32
    %148 = vector.broadcast %cst_47 : f32 to vector<2x64xf32>
    %149 = arith.mulf %148, %147 : vector<2x64xf32>
    %cst_48 = arith.constant 5.000000e-01 : f32
    %150 = vector.broadcast %cst_48 : f32 to vector<2x64xf32>
    %151 = arith.addf %149, %150 : vector<2x64xf32>
    %152 = vector.extract_strided_slice %141 {offsets = [0, 128], sizes = [2, 64], strides = [1, 1]} : vector<2x256xf32> to vector<2x64xf32>
    %cst_49 = arith.constant 5.000000e-01 : f32
    %153 = vector.broadcast %cst_49 : f32 to vector<2x64xf32>
    %154 = arith.mulf %153, %152 : vector<2x64xf32>
    %cst_50 = arith.constant 5.000000e-01 : f32
    %155 = vector.broadcast %cst_50 : f32 to vector<2x64xf32>
    %156 = arith.addf %154, %155 : vector<2x64xf32>
    %157 = vector.extract_strided_slice %141 {offsets = [0, 192], sizes = [2, 64], strides = [1, 1]} : vector<2x256xf32> to vector<2x64xf32>
    %158 = arith.mulf %151, %135 : vector<2x64xf32>
    %159 = arith.mulf %146, %157 : vector<2x64xf32>
    %160 = arith.addf %158, %159 : vector<2x64xf32>
    %161 = math.tanh %160 : vector<2x64xf32>
    %162 = arith.mulf %156, %161 : vector<2x64xf32>
    %cst_51 = arith.constant dense<0.000000e+00> : vector<2x256xf32>
    %163 = tpu.matmul %162, %6, %cst_51 {dimension_numbers = #tpu.dot_dimension_numbers<[1], [0], [0], [1], [0, 0, 1, 1], [], []>} : vector<2x64xf32>, vector<64x256xf32>, vector<2x256xf32> -> vector<2x256xf32>
    %164 = vector.extract_strided_slice %5 {offsets = [12, 0], sizes = [2, 256], strides = [1, 1]} : vector<16x256xf32> to vector<2x256xf32>
    %165 = arith.addf %163, %164 : vector<2x256xf32>
    %166 = math.tanh %165 : vector<2x256xf32>
    %167 = vector.extract_strided_slice %166 {offsets = [0, 0], sizes = [2, 64], strides = [1, 1]} : vector<2x256xf32> to vector<2x64xf32>
    %cst_52 = arith.constant 5.000000e-01 : f32
    %168 = vector.broadcast %cst_52 : f32 to vector<2x64xf32>
    %169 = arith.mulf %168, %167 : vector<2x64xf32>
    %cst_53 = arith.constant 5.000000e-01 : f32
    %170 = vector.broadcast %cst_53 : f32 to vector<2x64xf32>
    %171 = arith.addf %169, %170 : vector<2x64xf32>
    %172 = vector.extract_strided_slice %166 {offsets = [0, 64], sizes = [2, 64], strides = [1, 1]} : vector<2x256xf32> to vector<2x64xf32>
    %cst_54 = arith.constant 5.000000e-01 : f32
    %173 = vector.broadcast %cst_54 : f32 to vector<2x64xf32>
    %174 = arith.mulf %173, %172 : vector<2x64xf32>
    %cst_55 = arith.constant 5.000000e-01 : f32
    %175 = vector.broadcast %cst_55 : f32 to vector<2x64xf32>
    %176 = arith.addf %174, %175 : vector<2x64xf32>
    %177 = vector.extract_strided_slice %166 {offsets = [0, 128], sizes = [2, 64], strides = [1, 1]} : vector<2x256xf32> to vector<2x64xf32>
    %cst_56 = arith.constant 5.000000e-01 : f32
    %178 = vector.broadcast %cst_56 : f32 to vector<2x64xf32>
    %179 = arith.mulf %178, %177 : vector<2x64xf32>
    %cst_57 = arith.constant 5.000000e-01 : f32
    %180 = vector.broadcast %cst_57 : f32 to vector<2x64xf32>
    %181 = arith.addf %179, %180 : vector<2x64xf32>
    %182 = vector.extract_strided_slice %166 {offsets = [0, 192], sizes = [2, 64], strides = [1, 1]} : vector<2x256xf32> to vector<2x64xf32>
    %183 = arith.mulf %176, %160 : vector<2x64xf32>
    %184 = arith.mulf %171, %182 : vector<2x64xf32>
    %185 = arith.addf %183, %184 : vector<2x64xf32>
    %186 = math.tanh %185 : vector<2x64xf32>
    %187 = arith.mulf %181, %186 : vector<2x64xf32>
    %cst_58 = arith.constant dense<0.000000e+00> : vector<2x256xf32>
    %188 = tpu.matmul %187, %6, %cst_58 {dimension_numbers = #tpu.dot_dimension_numbers<[1], [0], [0], [1], [0, 0, 1, 1], [], []>} : vector<2x64xf32>, vector<64x256xf32>, vector<2x256xf32> -> vector<2x256xf32>
    %189 = vector.extract_strided_slice %5 {offsets = [14, 0], sizes = [2, 256], strides = [1, 1]} : vector<16x256xf32> to vector<2x256xf32>
    %190 = arith.addf %188, %189 : vector<2x256xf32>
    %191 = math.tanh %190 : vector<2x256xf32>
    %192 = vector.extract_strided_slice %191 {offsets = [0, 0], sizes = [2, 64], strides = [1, 1]} : vector<2x256xf32> to vector<2x64xf32>
    %cst_59 = arith.constant 5.000000e-01 : f32
    %193 = vector.broadcast %cst_59 : f32 to vector<2x64xf32>
    %194 = arith.mulf %193, %192 : vector<2x64xf32>
    %cst_60 = arith.constant 5.000000e-01 : f32
    %195 = vector.broadcast %cst_60 : f32 to vector<2x64xf32>
    %196 = arith.addf %194, %195 : vector<2x64xf32>
    %197 = vector.extract_strided_slice %191 {offsets = [0, 64], sizes = [2, 64], strides = [1, 1]} : vector<2x256xf32> to vector<2x64xf32>
    %cst_61 = arith.constant 5.000000e-01 : f32
    %198 = vector.broadcast %cst_61 : f32 to vector<2x64xf32>
    %199 = arith.mulf %198, %197 : vector<2x64xf32>
    %cst_62 = arith.constant 5.000000e-01 : f32
    %200 = vector.broadcast %cst_62 : f32 to vector<2x64xf32>
    %201 = arith.addf %199, %200 : vector<2x64xf32>
    %202 = vector.extract_strided_slice %191 {offsets = [0, 128], sizes = [2, 64], strides = [1, 1]} : vector<2x256xf32> to vector<2x64xf32>
    %cst_63 = arith.constant 5.000000e-01 : f32
    %203 = vector.broadcast %cst_63 : f32 to vector<2x64xf32>
    %204 = arith.mulf %203, %202 : vector<2x64xf32>
    %cst_64 = arith.constant 5.000000e-01 : f32
    %205 = vector.broadcast %cst_64 : f32 to vector<2x64xf32>
    %206 = arith.addf %204, %205 : vector<2x64xf32>
    %207 = vector.extract_strided_slice %191 {offsets = [0, 192], sizes = [2, 64], strides = [1, 1]} : vector<2x256xf32> to vector<2x64xf32>
    %208 = arith.mulf %201, %185 : vector<2x64xf32>
    %209 = arith.mulf %196, %207 : vector<2x64xf32>
    %210 = arith.addf %208, %209 : vector<2x64xf32>
    %211 = math.tanh %210 : vector<2x64xf32>
    %212 = arith.mulf %206, %211 : vector<2x64xf32>
    %cst_65 = arith.constant dense<0.000000e+00> : vector<2x256xf32>
    %213 = tpu.matmul %212, %6, %cst_65 {dimension_numbers = #tpu.dot_dimension_numbers<[1], [0], [0], [1], [0, 0, 1, 1], [], []>} : vector<2x64xf32>, vector<64x256xf32>, vector<2x256xf32> -> vector<2x256xf32>
    %214 = vector.broadcast %0 : vector<1x256xf32> to vector<2x256xf32>
    %215 = arith.addf %213, %214 : vector<2x256xf32>
    %216 = math.tanh %215 : vector<2x256xf32>
    %217 = vector.extract_strided_slice %216 {offsets = [0, 0], sizes = [2, 64], strides = [1, 1]} : vector<2x256xf32> to vector<2x64xf32>
    %cst_66 = arith.constant 5.000000e-01 : f32
    %218 = vector.broadcast %cst_66 : f32 to vector<2x64xf32>
    %219 = arith.mulf %218, %217 : vector<2x64xf32>
    %cst_67 = arith.constant 5.000000e-01 : f32
    %220 = vector.broadcast %cst_67 : f32 to vector<2x64xf32>
    %221 = arith.addf %219, %220 : vector<2x64xf32>
    %222 = vector.extract_strided_slice %216 {offsets = [0, 64], sizes = [2, 64], strides = [1, 1]} : vector<2x256xf32> to vector<2x64xf32>
    %cst_68 = arith.constant 5.000000e-01 : f32
    %223 = vector.broadcast %cst_68 : f32 to vector<2x64xf32>
    %224 = arith.mulf %223, %222 : vector<2x64xf32>
    %cst_69 = arith.constant 5.000000e-01 : f32
    %225 = vector.broadcast %cst_69 : f32 to vector<2x64xf32>
    %226 = arith.addf %224, %225 : vector<2x64xf32>
    %227 = vector.extract_strided_slice %216 {offsets = [0, 128], sizes = [2, 64], strides = [1, 1]} : vector<2x256xf32> to vector<2x64xf32>
    %cst_70 = arith.constant 5.000000e-01 : f32
    %228 = vector.broadcast %cst_70 : f32 to vector<2x64xf32>
    %229 = arith.mulf %228, %227 : vector<2x64xf32>
    %cst_71 = arith.constant 5.000000e-01 : f32
    %230 = vector.broadcast %cst_71 : f32 to vector<2x64xf32>
    %231 = arith.addf %229, %230 : vector<2x64xf32>
    %232 = vector.extract_strided_slice %216 {offsets = [0, 192], sizes = [2, 64], strides = [1, 1]} : vector<2x256xf32> to vector<2x64xf32>
    %233 = arith.mulf %226, %210 : vector<2x64xf32>
    %234 = arith.mulf %221, %232 : vector<2x64xf32>
    %235 = arith.addf %233, %234 : vector<2x64xf32>
    %236 = math.tanh %235 : vector<2x64xf32>
    %237 = arith.mulf %231, %236 : vector<2x64xf32>
    %238 = vector.extract_strided_slice %237 {offsets = [0, 32], sizes = [2, 32], strides = [1, 1]} : vector<2x64xf32> to vector<2x32xf32>
    %c0_72 = arith.constant 0 : index
    %c0_73 = arith.constant 0 : index
    %239 = vector.load %arg4[%c0_72, %c0_73] : memref<32x4xf32, #tpu.memory_space<vmem>>, vector<32x4xf32>
    %cst_74 = arith.constant dense<0.000000e+00> : vector<2x4xf32>
    %240 = tpu.matmul %238, %239, %cst_74 {dimension_numbers = #tpu.dot_dimension_numbers<[1], [0], [0], [1], [0, 0, 1, 1], [], []>} : vector<2x32xf32>, vector<32x4xf32>, vector<2x4xf32> -> vector<2x4xf32>
    %c0_75 = arith.constant 0 : index
    %c0_76 = arith.constant 0 : index
    %241 = vector.load %arg5[%c0_75, %c0_76] : memref<1x4xf32, #tpu.memory_space<vmem>>, vector<1x4xf32>
    %242 = vector.broadcast %241 : vector<1x4xf32> to vector<2x4xf32>
    %243 = arith.addf %240, %242 : vector<2x4xf32>
    %c0_77 = arith.constant 0 : index
    %c0_78 = arith.constant 0 : index
    %244 = vector.load %arg6[%c0_77, %c0_78] : memref<2x4xf32, #tpu.memory_space<vmem>>, vector<2x4xf32>
    tpu.vector_store %arg6[%c0_77, %c0_78], %243 {strides = array<i32>} : memref<2x4xf32, #tpu.memory_space<vmem>>, vector<2x4xf32>,
    return
  }
}

</mosaic_0001>

<bundles_post_ra>
// kernel: tpu_custom_call.1
= control target key start
LH: loop header
LB: loop body
LE: loop exit
PB: predicated region body
PF: predicated region fallthrough
CT: control target
= control target key end

     0   :  { %11 = vsyncpa [#allocation3], 0  ;;  %s1705_s0 = inlined_call_operand.hbm [shape: f32[16,16], index: 0, kind: input, shape index: {}]   ;;  %s1706_s1 = inlined_call_operand.vmem [shape: f32[16,256], index: 1, kind: input, shape index: {}]   ;;  %s1707_s2 = inlined_call_operand.hbm [shape: f32[64,256], index: 2, kind: input, shape index: {}]   ;;  %s1708_s3 = inlined_call_operand.vmem [shape: f32[1,256], index: 3, kind: input, shape index: {}]   ;;  %s1709_s4 = inlined_call_operand.vmem [shape: f32[32,4], index: 4, kind: input, shape index: {}]   ;;  %s1710_s5 = inlined_call_operand.vmem [shape: f32[1,4], index: 5, kind: input, shape index: {}]   ;;  %s1711_s6 = inlined_call_operand.hbm [shape: f32[2,4], index: 6, kind: output, shape index: {}]  }
   0x1   :  { %12 = vsyncpa [#allocation6], 0 }
   0x2   :  { %13 = vsyncpa [#allocation4], 0  ;;  %s1420_s21 = smov [#allocation2]   ;;  %s1348_s25 = scalar_lea.hbm %s1705_s0, 256 }
   0x3   :  { %s19_s22 = sshll.u32 %s1420_s21, 4  ;;  %p1349_p0 = scmp.ne.s32.totalorder %s1705_s0, %s1348_s25  ;;  %s20_s22 = int_to_ptr.vmem [resolvable:$true] %s19_s22 }
   0x4   :  { %p1352_p1 = scmp.lt.u32.totalorder %s1348_s25, %s1705_s0 }
   0x6   :  { %p1354_p2 = pnand %p1352_p1, %p1349_p0 }
   0x8   :  { %1357 = shalt.err (!%p1354_p2)
}
   0x9   :  { %s1358_s30 = scalar_lea.vmem %s20_s22, 256  ;;  %p1363_p4 = scmp.lt.s32.totalorder %s20_s22, %s20_s22 }
   0xa   :  { %p1359_p3 = scmp.ne.s32.totalorder %s20_s22, %s1358_s30  ;;  %p1364_p5 = scmp.lt.s32.totalorder %s1358_s30, %s1358_s30 }
   0xc   :  { %p1365_p6 = por %p1364_p5, %p1363_p4 }
   0xe   :  { %p1366_p7 = pnand %p1365_p6, %p1359_p3 }
  0x10   :  { %1369 = shalt.err (!%p1366_p7)
}
  0x11   :  { %s1421_s7 = smov 128   ;;  %s1422_s8 = smov 8  }
  0x12   :  { %25 = dma.hbm_to_vmem [thread:$0]  %s1705_s0, 256, %s20_s22, [#allocation3], %s1421_s7, %s1421_s7, %s1422_s8  }
  0x13   :  { %s1423_s11 = smov [#allocation5]   ;;  %s1370_s15 = scalar_lea.hbm %s1707_s2, 2048 }
  0x14   :  { %s33_s12 = sshll.u32 %s1423_s11, 4  ;;  %p1371_p8 = scmp.ne.s32.totalorder %s1707_s2, %s1370_s15  ;;  %s34_s12 = int_to_ptr.vmem [resolvable:$true] %s33_s12 }
  0x15   :  { %p1374_p9 = scmp.lt.u32.totalorder %s1370_s15, %s1707_s2 }
  0x17   :  { %p1376_p10 = pnand %p1374_p9, %p1371_p8 }
  0x19   :  { %1379 = shalt.err (!%p1376_p10)
}
  0x1a   :  { %s1380_s20 = scalar_lea.vmem %s34_s12, 2048  ;;  %p1385_p12 = scmp.lt.s32.totalorder %s34_s12, %s34_s12 }
  0x1b   :  { %p1381_p11 = scmp.ne.s32.totalorder %s34_s12, %s1380_s20  ;;  %p1386_p13 = scmp.lt.s32.totalorder %s1380_s20, %s1380_s20 }
  0x1d   :  { %p1387_p0 = por %p1386_p13, %p1385_p12 }
  0x1f   :  { %p1388_p1 = pnand %p1387_p0, %p1381_p11 }
  0x21   :  { %1391 = shalt.err (!%p1388_p1)
}
  0x22   :  { %s1424_s0 = smov 256   ;;  %s1425_s21 = smov 16  }
  0x23   :  { %39 = dma.hbm_to_vmem [thread:$0]  %s1707_s2, 2048, %s34_s12, [#allocation6], %s1424_s0, %s1424_s0, %s1425_s21  }
  0x24   :  { %1414 = dma.done.wait [#allocation3], 256  }
  0x25   :  { %1415 = vsyncadd [#allocation3], 4294967040 }
  0x26   :  { %1416 = dma.done.wait [#allocation6], 2048  }
  0x27   :  { %1417 = vsyncadd [#allocation6], 4294965248  ;;  %v1426_v0 = vmov 0.0   ;;  %v56_v1 = vld [vmem:[%s1706_s1 + $0x8] sm:$0xff]  ;;  %v58_v2 = vld [vmem:[%s1706_s1 + $0x18] sm:$0xff]  ;;  %vm70_vm0 = vcmask 130048   ;;  %v60_v8 = vlaneseq }
  0x28   :  { %141 = vmatprep.mubr.f32.mxu0 %v1426_v0  ;;  %276 = vmatprep.mubr.f32.mxu1 %v1426_v0  ;;  %v55_v3 = vld [vmem:[%s1706_s1] sm:$0xff]  ;;  %v1144_v4 = vpack.c.bf16 %v58_v2, %v56_v1  ;;  %v57_v5 = vld [vmem:[%s1706_s1 + $0x10] sm:$0xff]  ;;  %s1427_s1 = smov 64   ;;  %v155_v25 = vld [vmem:[#allocation5 + $0x8] sm:$0xff]  ;;  %vm208_vm2 = vcmask 523264   ;;  %vm1429_vm3 = vmmov 0  }
  0x29   :  { %v1146_v6 = vpack.c.bf16 %v57_v5, %v55_v3  ;;  %v53_v7 = vld [vmem:[#allocation2] sm:$0xff]  ;;  %v61_v9 = vshrl.u32 %v60_v8, 7  ;;  %v157_v26 = vld [vmem:[#allocation5 + $0x18] sm:$0xff]  ;;  %v154_v27 = vld [vmem:[#allocation5] sm:$0xff]  ;;  %v194_v54 = vand.u32 127, %v60_v8  ;;  %s1430_s16 = smov 96  }
  0x2a   :  { %1145 = vmatprep.subr.bf16.mxu0 %v1144_v4  ;;  %v52_v11 = vld [vmem:[%s1708_s3] sm:$0x3]  ;;  %v1525_v28 = vpack.c.bf16 %v157_v26, %v155_v25  ;;  %v159_v30 = vld [vmem:[#allocation5 + $0x28] sm:$0xff]  ;;  %v161_v31 = vld [vmem:[#allocation5 + $0x38] sm:$0xff]  ;;  %vm1025_vm4 = vcmask 261120   ;;  %s1431_s18 = smov [#allocation7]  }
  0x2b   :  { %1147 = vmatpush1.bf16.msra.mxu0 %v1146_v6  ;;  %v66_v10 = vsub.s32 1, %v61_v9  ;;  %v62_v17 = vsub.s32 0, %v61_v9  ;;  %v156_v29 = vld [vmem:[#allocation5 + $0x10] sm:$0xff]  ;;  %v1529_v33 = vpack.c.bf16 %v161_v31, %v159_v30  ;;  %v158_v34 = vld [vmem:[#allocation5 + $0x20] sm:$0xff]  ;;  %v163_v36 = vld [vmem:[#allocation5 + $0x48] sm:$0xff]  ;;  %vm195_vm1 = vcmp.lt.s32.totalorder %v194_v54, 32 }
  0x2c   :  { %v1527_v32 = vpack.c.bf16 %v156_v29, %v154_v27  ;;  %v160_v35 = vld [vmem:[#allocation5 + $0x30] sm:$0xff]  ;;  %1149 = vmatprep.subr.bf16.mxu1 %v1525_v28  ;;  %v165_v37 = vld [vmem:[#allocation5 + $0x58] sm:$0xff]  ;;  %1165 = vmatprep.subr.bf16.mxu0 %v1525_v28  ;;  %v162_v40 = vld [vmem:[#allocation5 + $0x40] sm:$0xff]  ;;  %s1106_s19 = sshll.u32 %s1431_s18, 4  ;;  %vm1098_vm5 = vcmask 25600   ;;  %s1107_s19 = int_to_ptr.vmem [resolvable:$true] %s1106_s19 }
  0x2d   :  { %v1511_v12 = vrot.slane %v52_v11, %v66_v10  ;;  %v1518_v18 = vrot.slane %v52_v11, %v62_v17  ;;  %v1534_v38 = vpack.c.bf16 %v160_v35, %v158_v34  ;;  %v1538_v39 = vpack.c.bf16 %v165_v37, %v163_v36  ;;  %v164_v41 = vld [vmem:[#allocation5 + $0x50] sm:$0xff]  ;;  %v167_v42 = vld [vmem:[#allocation5 + $0x68] sm:$0xff]  ;;  %v169_v43 = vld [vmem:[#allocation5 + $0x78] sm:$0xff]  ;;  %s1392_s20 = scalar_lea.vmem %s1107_s19, 32  ;;  %p1397_p3 = scmp.lt.s32.totalorder %s1107_s19, %s1107_s19 }
  0x2e   :  { %1116 = vmatmul.mubr.msk.f32.vlgmr.msra.gmra.mrb[0].mxu0 %vm70_vm0, %v53_v7  ;;  %1151 = vmatpush1.bf16.msra.mxu1 %v1527_v32  ;;  %v1542_v44 = vpack.c.bf16 %v164_v41, %v162_v40  ;;  %v1546_v45 = vpack.c.bf16 %v169_v43, %v167_v42  ;;  %v166_v46 = vld [vmem:[#allocation5 + $0x60] sm:$0xff]  ;;  %v168_v47 = vld [vmem:[#allocation5 + $0x70] sm:$0xff]  ;;  %v54_v10 = vld [vmem:[#allocation2 + $0x8] sm:$0xff]  ;;  %p1393_p2 = scmp.ne.s32.totalorder %s1107_s19, %s1392_s20  ;;  %p1398_p4 = scmp.lt.s32.totalorder %s1392_s20, %s1392_s20 }
  0x2f   :  { %147 = vmatprep.mubr.f32.mxu0 %v1426_v0  ;;  %1167 = vmatpush1.bf16.msra.mxu0 %v1527_v32  ;;  %v1553_v49 = vpack.c.bf16 %v168_v47, %v166_v46 }
  0x30   :  { %1153 = vmatprep.subr.bf16.mxu1 %v1529_v33  ;;  %1169 = vmatprep.subr.bf16.mxu0 %v1529_v33  ;;  %p1399_p5 = por %p1398_p4, %p1397_p3 }
  0x32   :  { %1155 = vmatpush1.bf16.msra.mxu1 %v1534_v38  ;;  %1117 = vmatmul.mubr.msk.f32.gmra.mrb[2].mxu0 %vm70_vm0, %v54_v10  ;;  %p1400_p6 = pnand %p1399_p5, %p1393_p2 }
  0x33   :  { %1171 = vmatpush1.bf16.msra.mxu0 %v1534_v38  ;;  %1157 = vmatprep.subr.bf16.mxu1 %v1538_v39 }
  0x34   :  { %1173 = vmatprep.subr.bf16.mxu0 %v1538_v39  ;;  %381 = vmatprep.mubr.f32.mxu0 %v1426_v0 }
  0x36   :  { %1159 = vmatpush1.bf16.msra.mxu1 %v1542_v44 }
  0x37   :  { %1175 = vmatpush1.bf16.msra.mxu0 %v1542_v44  ;;  %1161 = vmatprep.subr.bf16.mxu1 %v1546_v45 }
  0x38   :  { %1177 = vmatprep.subr.bf16.mxu0 %v1546_v45 }
  0x3a   :  { %1163 = vmatpush1.bf16.msra.mxu1 %v1553_v49 }
  0x3b   :  { %1179 = vmatpush1.bf16.msra.mxu0 %v1553_v49  ;;  %1181 = vmatprep.subr.bf16.mxu1 %v1525_v28 }
  0x3c   :  { %1197 = vmatprep.subr.bf16.mxu0 %v1525_v28 }
 0x101   :  { %v143_v13 = vpop.f32.mrb[0].mxu0 }
 0x102   :  { %v145_v14 = vpop.f32.mrb[1].mxu0  ;;  %v1521_v19 = vadd.f32 %v143_v13, %v1518_v18 }
 0x103   :  { %v1514_v15 = vadd.f32 %v145_v14, %v1511_v12 }
 0x104   :  { %v204_v61 = vrot.slane %v1521_v19, 2  ;;  %v310_v26 = vrot.slane %v1521_v19, 4  ;;  %v411_v54 = vrot.slane %v1521_v19, 6 }
 0x105   :  { %1294 = vtanh.f32 %v1514_v15  ;;  %v205_v63 = vrot.slane %v1514_v15, 2  ;;  %v311_v29 = vrot.slane %v1514_v15, 4 }
 0x106   :  { %1296 = vtanh.f32 %v1521_v19 }
 0x10f   :  { %v1295_v16 = vpop.eup %1294 }
 0x110   :  { %178 = vrot.lane.b32.xlu0 %v1295_v16, %s1427_s1  ;;  %v1297_v20 = vpop.eup %1296  ;;  %v174_v53 = vmul.f32 0.5, %v1295_v16 }
 0x111   :  { %v172_v21 = vmul.f32 0.5, %v1297_v20  ;;  %v1580_v20 = vpop.f32.mrb[2].mxu0 }
 0x112   :  { %v175_v55 = vadd.f32 0.5, %v174_v53 }
 0x113   :  { %v173_v22 = vadd.f32 0.5, %v172_v21  ;;  %v1582_v21 = vpop.f32.mrb[3].mxu0 }
 0x115   :  { %v176_v48 = vmul.f32 0.0, %v173_v22 }
 0x182   :  { %v179_v23 = vpop.permute.xlu0 %178 }
 0x183   :  { %v181_v24 = vmul.f32 %v179_v23, %v173_v22 }
 0x185   :  { %183 = vrot.lane.b32.xlu0 %v181_v24, %s1427_s1 }
 0x1f7   :  { %v184_v50 = vpop.permute.xlu0 %183 }
 0x1f8   :  { %v186_v51 = vadd.f32 %v184_v50, %v176_v48 }
 0x1fa   :  { %1298 = vtanh.f32 %v186_v51 }
 0x204   :  { %v1299_v52 = vpop.eup %1298 }
 0x205   :  { %189 = vrot.lane.b32.xlu1 %v1299_v52, %s1427_s1 }
 0x209   :  { %198 = vrot.lane.b32.xlu1 %v186_v51, %s1427_s1 }
 0x277   :  { %v190_v56 = vpop.permute.xlu1 %189 }
 0x278   :  { %v192_v57 = vmul.f32 %v190_v56, %v175_v55  ;;  %v412_v56 = vrot.slane %v1514_v15, 6 }
 0x27a   :  { %v196_v58 = vsel %vm195_vm1, %v192_v57, 0.0 }
 0x27b   :  { %1118 = vmatmul.mubr.msk.f32.vlgmr.msra.gmra.mrb[0].mxu1 %vm208_vm2, %v196_v58  ;;  %v199_v59 = vpop.permute.xlu1 %198 }
 0x27c   :  { %v201_v60 = vsel %vm195_vm1, %v199_v59, 0.0  ;;  %1183 = vmatpush1.bf16.msra.mxu1 %v1527_v32  ;;  %482 = vmatprep.mubr.f32.mxu1 %v1426_v0 }
 0x27d   :  { %290 = vrot.lane.b32.xlu1 %v201_v60, %s1427_s1  ;;  %1185 = vmatprep.subr.bf16.mxu1 %v1529_v33 }
 0x280   :  { %1187 = vmatpush1.bf16.msra.mxu1 %v1534_v38 }
 0x281   :  { %1189 = vmatprep.subr.bf16.mxu1 %v1538_v39 }
 0x284   :  { %1191 = vmatpush1.bf16.msra.mxu1 %v1542_v44 }
 0x285   :  { %1193 = vmatprep.subr.bf16.mxu1 %v1546_v45 }
 0x288   :  { %1195 = vmatpush1.bf16.msra.mxu1 %v1553_v49 }
 0x289   :  { %1213 = vmatprep.subr.bf16.mxu1 %v1525_v28 }
 0x2ef   :  { %v291_v11 = vpop.permute.xlu1 %290 }
 0x34e   :  { %v278_v62 = vpop.f32.mrb[0].mxu1 }
 0x34f   :  { %v279_v1 = vadd.f32 %v278_v62, %v204_v61  ;;  %v280_v2 = vpop.f32.mrb[1].mxu1 }
 0x350   :  { %v281_v3 = vadd.f32 %v280_v2, %v205_v63 }
 0x352   :  { %1300 = vtanh.f32 %v281_v3 }
 0x353   :  { %1302 = vtanh.f32 %v279_v1 }
 0x35c   :  { %v1301_v4 = vpop.eup %1300 }
 0x35d   :  { %295 = vrot.lane.b32.xlu0 %v1301_v4, %s1427_s1  ;;  %v1303_v5 = vpop.eup %1302  ;;  %v287_v22 = vmul.f32 0.5, %v1301_v4 }
 0x35e   :  { %v285_v6 = vmul.f32 0.5, %v1303_v5 }
 0x35f   :  { %v288_v23 = vadd.f32 0.5, %v287_v22 }
 0x360   :  { %v286_v7 = vadd.f32 0.5, %v285_v6 }
 0x362   :  { %v293_v13 = vmul.f32 %v291_v11, %v286_v7 }
 0x3cf   :  { %v296_v8 = vpop.permute.xlu0 %295 }
 0x3d0   :  { %v298_v9 = vmul.f32 %v296_v8, %v286_v7 }
 0x3d2   :  { %300 = vrot.lane.b32.xlu0 %v298_v9, %s1427_s1  ;;  %v1626_v9 = vadd.f32 %v1582_v21, %v1511_v12 }
 0x444   :  { %v301_v14 = vpop.permute.xlu0 %300 }
 0x445   :  { %v303_v16 = vadd.f32 %v301_v14, %v293_v13 }
 0x447   :  { %1304 = vtanh.f32 %v303_v16 }
 0x451   :  { %v1305_v17 = vpop.eup %1304 }
 0x452   :  { %306 = vrot.lane.b32.xlu1 %v1305_v17, %s1427_s1 }
 0x4c4   :  { %v307_v24 = vpop.permute.xlu1 %306 }
 0x4c5   :  { %v309_v25 = vmul.f32 %v307_v24, %v288_v23 }
 0x4c7   :  { %1119 = vmatmul.mubr.msk.f32.vlgmr.msra.gmra.mrb[4].mxu0 %vm208_vm2, %v309_v25 }
 0x4c8   :  { %1199 = vmatpush1.bf16.msra.mxu0 %v1527_v32  ;;  %579 = vmatprep.mubr.f32.mxu0 %v1426_v0 }
 0x4c9   :  { %1201 = vmatprep.subr.bf16.mxu0 %v1529_v33 }
 0x4cc   :  { %1203 = vmatpush1.bf16.msra.mxu0 %v1534_v38 }
 0x4cd   :  { %1205 = vmatprep.subr.bf16.mxu0 %v1538_v39 }
 0x4d0   :  { %1207 = vmatpush1.bf16.msra.mxu0 %v1542_v44 }
 0x4d1   :  { %1209 = vmatprep.subr.bf16.mxu0 %v1546_v45 }
 0x4d4   :  { %1211 = vmatpush1.bf16.msra.mxu0 %v1553_v49 }
 0x4d5   :  { %1229 = vmatprep.subr.bf16.mxu0 %v1525_v28 }
 0x59a   :  { %v383_v27 = vpop.f32.mrb[4].mxu0 }
 0x59b   :  { %v384_v30 = vadd.f32 %v383_v27, %v310_v26  ;;  %v385_v31 = vpop.f32.mrb[5].mxu0 }
 0x59c   :  { %v386_v34 = vadd.f32 %v385_v31, %v311_v29 }
 0x59e   :  { %1306 = vtanh.f32 %v386_v34 }
 0x59f   :  { %1308 = vtanh.f32 %v384_v30 }
 0x5a8   :  { %v1307_v35 = vpop.eup %1306 }
 0x5a9   :  { %396 = vrot.lane.b32.xlu0 %v1307_v35, %s1427_s1  ;;  %v1309_v36 = vpop.eup %1308  ;;  %v392_v50 = vmul.f32 0.5, %v1307_v35 }
 0x5aa   :  { %v390_v37 = vmul.f32 0.5, %v1309_v36  ;;  %v612_v36 = vrot.slane %v1626_v9, 2 }
 0x5ab   :  { %v393_v51 = vadd.f32 0.5, %v392_v50 }
 0x5ac   :  { %v391_v40 = vadd.f32 0.5, %v390_v37 }
 0x5ae   :  { %v394_v43 = vmul.f32 %v391_v40, %v303_v16  ;;  %v1632_v16 = vadd.f32 %v1580_v20, %v1518_v18 }
 0x61b   :  { %v397_v41 = vpop.permute.xlu0 %396 }
 0x61c   :  { %v399_v42 = vmul.f32 %v397_v41, %v391_v40 }
 0x61e   :  { %401 = vrot.lane.b32.xlu1 %v399_v42, %s1427_s1  ;;  %v611_v42 = vrot.slane %v1632_v16, 2 }
 0x690   :  { %v402_v46 = vpop.permute.xlu1 %401 }
 0x691   :  { %v404_v47 = vadd.f32 %v402_v46, %v394_v43 }
 0x693   :  { %1310 = vtanh.f32 %v404_v47 }
 0x69d   :  { %v1311_v48 = vpop.eup %1310 }
 0x69e   :  { %407 = vrot.lane.b32.xlu0 %v1311_v48, %s1427_s1 }
 0x710   :  { %v408_v52 = vpop.permute.xlu0 %407 }
 0x711   :  { %v410_v53 = vmul.f32 %v408_v52, %v393_v51 }
 0x713   :  { %1120 = vmatmul.mubr.msk.f32.vlgmr.msra.gmra.mrb[2].mxu1 %vm208_vm2, %v410_v53 }
 0x714   :  { %1215 = vmatpush1.bf16.msra.mxu1 %v1527_v32  ;;  %682 = vmatprep.mubr.f32.mxu1 %v1426_v0 }
 0x715   :  { %1217 = vmatprep.subr.bf16.mxu1 %v1529_v33 }
 0x718   :  { %1219 = vmatpush1.bf16.msra.mxu1 %v1534_v38 }
 0x719   :  { %1221 = vmatprep.subr.bf16.mxu1 %v1538_v39 }
 0x71c   :  { %1223 = vmatpush1.bf16.msra.mxu1 %v1542_v44 }
 0x71d   :  { %1225 = vmatprep.subr.bf16.mxu1 %v1546_v45 }
 0x720   :  { %1227 = vmatpush1.bf16.msra.mxu1 %v1553_v49 }
 0x721   :  { %1245 = vmatprep.subr.bf16.mxu1 %v1525_v28 }
 0x7e6   :  { %v484_v55 = vpop.f32.mrb[2].mxu1 }
 0x7e7   :  { %v485_v57 = vadd.f32 %v484_v55, %v411_v54  ;;  %v486_v58 = vpop.f32.mrb[3].mxu1 }
 0x7e8   :  { %v487_v59 = vadd.f32 %v486_v58, %v412_v56 }
 0x7ea   :  { %1312 = vtanh.f32 %v487_v59 }
 0x7eb   :  { %1314 = vtanh.f32 %v485_v57 }
 0x7f4   :  { %v1313_v60 = vpop.eup %1312 }
 0x7f5   :  { %497 = vrot.lane.b32.xlu1 %v1313_v60, %s1427_s1  ;;  %v1315_v61 = vpop.eup %1314  ;;  %v493_v5 = vmul.f32 0.5, %v1313_v60 }
 0x7f6   :  { %v491_v62 = vmul.f32 0.5, %v1315_v61  ;;  %v713_v61 = vrot.slane %v1626_v9, 4 }
 0x7f7   :  { %v494_v6 = vadd.f32 0.5, %v493_v5 }
 0x7f8   :  { %v492_v63 = vadd.f32 0.5, %v491_v62 }
 0x7fa   :  { %v495_v3 = vmul.f32 %v492_v63, %v404_v47 }
 0x867   :  { %v498_v1 = vpop.permute.xlu1 %497 }
 0x868   :  { %v500_v2 = vmul.f32 %v498_v1, %v492_v63 }
 0x86a   :  { %502 = vrot.lane.b32.xlu0 %v500_v2, %s1427_s1 }
 0x8dc   :  { %v503_v19 = vpop.permute.xlu0 %502 }
 0x8dd   :  { %v505_v4 = vadd.f32 %v503_v19, %v495_v3 }
 0x8df   :  { %1316 = vtanh.f32 %v505_v4 }
 0x8e9   :  { %v1317_v15 = vpop.eup %1316 }
 0x8ea   :  { %508 = vrot.lane.b32.xlu1 %v1317_v15, %s1427_s1 }
 0x95c   :  { %v509_v7 = vpop.permute.xlu1 %508 }
 0x95d   :  { %v511_v8 = vmul.f32 %v509_v7, %v494_v6 }
 0x95f   :  { %1121 = vmatmul.mubr.msk.f32.vlgmr.msra.gmra.mrb[6].mxu0 %vm208_vm2, %v511_v8 }
 0x960   :  { %1231 = vmatpush1.bf16.msra.mxu0 %v1527_v32  ;;  %783 = vmatprep.mubr.f32.mxu0 %v1426_v0 }
 0x961   :  { %1233 = vmatprep.subr.bf16.mxu0 %v1529_v33 }
 0x964   :  { %1235 = vmatpush1.bf16.msra.mxu0 %v1534_v38 }
 0x965   :  { %1237 = vmatprep.subr.bf16.mxu0 %v1538_v39 }
 0x968   :  { %1239 = vmatpush1.bf16.msra.mxu0 %v1542_v44 }
 0x969   :  { %1241 = vmatprep.subr.bf16.mxu0 %v1546_v45 }
 0x96c   :  { %1243 = vmatpush1.bf16.msra.mxu0 %v1553_v49 }
 0x96d   :  { %1261 = vmatprep.subr.bf16.mxu0 %v1525_v28 }
 0xa32   :  { %v581_v10 = vpop.f32.mrb[6].mxu0 }
 0xa33   :  { %v583_v11 = vpop.f32.mrb[7].mxu0  ;;  %v582_v17 = vadd.f32 %v581_v10, %v1632_v16  ;;  %v814_v10 = vrot.slane %v1626_v9, 6 }
 0xa34   :  { %v584_v13 = vadd.f32 %v583_v11, %v1626_v9 }
 0xa36   :  { %1318 = vtanh.f32 %v584_v13 }
 0xa37   :  { %1320 = vtanh.f32 %v582_v17  ;;  %v813_v17 = vrot.slane %v1632_v16, 6 }
 0xa40   :  { %v1319_v14 = vpop.eup %1318 }
 0xa41   :  { %594 = vrot.lane.b32.xlu0 %v1319_v14, %s1427_s1  ;;  %v1321_v28 = vpop.eup %1320  ;;  %v590_v30 = vmul.f32 0.5, %v1319_v14 }
 0xa42   :  { %v588_v22 = vmul.f32 0.5, %v1321_v28 }
 0xa43   :  { %v591_v20 = vadd.f32 0.5, %v590_v30 }
 0xa44   :  { %v589_v23 = vadd.f32 0.5, %v588_v22 }
 0xa46   :  { %v592_v25 = vmul.f32 %v589_v23, %v505_v4 }
 0xab3   :  { %v595_v21 = vpop.permute.xlu0 %594 }
 0xab4   :  { %v597_v24 = vmul.f32 %v595_v21, %v589_v23 }
 0xab6   :  { %599 = vrot.lane.b32.xlu1 %v597_v24, %s1427_s1 }
 0xb28   :  { %v600_v26 = vpop.permute.xlu1 %599 }
 0xb29   :  { %v602_v27 = vadd.f32 %v600_v26, %v592_v25 }
 0xb2b   :  { %1322 = vtanh.f32 %v602_v27 }
 0xb35   :  { %v1323_v29 = vpop.eup %1322 }
 0xb36   :  { %605 = vrot.lane.b32.xlu0 %v1323_v29, %s1427_s1 }
 0xba8   :  { %v606_v31 = vpop.permute.xlu0 %605 }
 0xba9   :  { %v608_v34 = vmul.f32 %v606_v31, %v591_v20 }
 0xbab   :  { %1122 = vmatmul.mubr.msk.f32.vlgmr.msra.gmra.mrb[4].mxu1 %vm208_vm2, %v608_v34 }
 0xbac   :  { %1247 = vmatpush1.bf16.msra.mxu1 %v1527_v32  ;;  %884 = vmatprep.mubr.f32.mxu1 %v1426_v0 }
 0xbad   :  { %1249 = vmatprep.subr.bf16.mxu1 %v1529_v33 }
 0xbb0   :  { %1251 = vmatpush1.bf16.msra.mxu1 %v1534_v38 }
 0xbb1   :  { %1253 = vmatprep.subr.bf16.mxu1 %v1538_v39 }
 0xbb4   :  { %1255 = vmatpush1.bf16.msra.mxu1 %v1542_v44 }
 0xbb5   :  { %1257 = vmatprep.subr.bf16.mxu1 %v1546_v45 }
 0xbb8   :  { %1259 = vmatpush1.bf16.msra.mxu1 %v1553_v49 }
 0xc7e   :  { %v684_v35 = vpop.f32.mrb[4].mxu1 }
 0xc7f   :  { %v686_v37 = vpop.f32.mrb[5].mxu1  ;;  %v685_v43 = vadd.f32 %v684_v35, %v611_v42 }
 0xc80   :  { %v687_v40 = vadd.f32 %v686_v37, %v612_v36 }
 0xc82   :  { %1324 = vtanh.f32 %v687_v40 }
 0xc83   :  { %1326 = vtanh.f32 %v685_v43 }
 0xc8c   :  { %v1325_v41 = vpop.eup %1324 }
 0xc8d   :  { %697 = vrot.lane.b32.xlu1 %v1325_v41, %s1427_s1  ;;  %v1327_v46 = vpop.eup %1326  ;;  %v693_v56 = vmul.f32 0.5, %v1325_v41 }
 0xc8e   :  { %v691_v47 = vmul.f32 0.5, %v1327_v46 }
 0xc8f   :  { %v694_v57 = vadd.f32 0.5, %v693_v56 }
 0xc90   :  { %v692_v48 = vadd.f32 0.5, %v691_v47 }
 0xc92   :  { %v695_v52 = vmul.f32 %v692_v48, %v602_v27 }
 0xcff   :  { %v698_v50 = vpop.permute.xlu1 %697 }
 0xd00   :  { %v700_v51 = vmul.f32 %v698_v50, %v692_v48 }
 0xd02   :  { %702 = vrot.lane.b32.xlu0 %v700_v51, %s1427_s1 }
 0xd74   :  { %v703_v53 = vpop.permute.xlu0 %702 }
 0xd75   :  { %v705_v54 = vadd.f32 %v703_v53, %v695_v52  ;;  %v1013_v52 = vld [vmem:[%s1709_s4 + $0x10] sm:$0xff]  ;;  %v1428_v53 = vmov 0.0|0.0  }
 0xd76   :  { %1276 = vmatprep.subr.bf16.mxu1 %v1428_v53 }
 0xd77   :  { %1328 = vtanh.f32 %v705_v54 }
 0xd81   :  { %v1329_v55 = vpop.eup %1328 }
 0xd82   :  { %708 = vrot.lane.b32.xlu1 %v1329_v55, %s1427_s1  ;;  %v1014_v55 = vld [vmem:[%s1709_s4 + $0x18] sm:$0xff] }
 0xd83   :  { %v1280_v56 = vpack.c.bf16 %v1014_v55, %v1013_v52 }
 0xdf4   :  { %v709_v58 = vpop.permute.xlu1 %708 }
 0xdf5   :  { %v711_v59 = vmul.f32 %v709_v58, %v694_v57 }
 0xdf7   :  { %1123 = vmatmul.mubr.msk.f32.vlgmr.msra.gmra.mrb[8].mxu0 %vm208_vm2, %v711_v59 }
 0xdf8   :  { %1263 = vmatpush1.bf16.msra.mxu0 %v1527_v32  ;;  %981 = vmatprep.mubr.f32.mxu0 %v1426_v0 }
 0xdf9   :  { %1265 = vmatprep.subr.bf16.mxu0 %v1529_v33  ;;  %v712_v33 = vrot.slane %v1632_v16, 4 }
 0xdfc   :  { %1267 = vmatpush1.bf16.msra.mxu0 %v1534_v38 }
 0xdfd   :  { %1269 = vmatprep.subr.bf16.mxu0 %v1538_v39 }
 0xe00   :  { %1271 = vmatpush1.bf16.msra.mxu0 %v1542_v44 }
 0xe01   :  { %1273 = vmatprep.subr.bf16.mxu0 %v1546_v45 }
 0xe04   :  { %1275 = vmatpush1.bf16.msra.mxu0 %v1553_v49 }
 0xeca   :  { %v785_v60 = vpop.f32.mrb[8].mxu0 }
 0xecb   :  { %v787_v62 = vpop.f32.mrb[9].mxu0  ;;  %v786_v38 = vadd.f32 %v785_v60, %v712_v33 }
 0xecc   :  { %v788_v63 = vadd.f32 %v787_v62, %v713_v61 }
 0xece   :  { %1330 = vtanh.f32 %v788_v63 }
 0xecf   :  { %1332 = vtanh.f32 %v786_v38 }
 0xed8   :  { %v1331_v32 = vpop.eup %1330 }
 0xed9   :  { %798 = vrot.lane.b32.xlu0 %v1331_v32, %s1427_s1  ;;  %v1333_v39 = vpop.eup %1332  ;;  %v794_v15 = vmul.f32 0.5, %v1331_v32 }
 0xeda   :  { %v792_v1 = vmul.f32 0.5, %v1333_v39 }
 0xedb   :  { %v795_v5 = vadd.f32 0.5, %v794_v15 }
 0xedc   :  { %v793_v44 = vadd.f32 0.5, %v792_v1 }
 0xede   :  { %v796_v49 = vmul.f32 %v793_v44, %v705_v54 }
 0xf4b   :  { %v799_v2 = vpop.permute.xlu0 %798 }
 0xf4c   :  { %v801_v45 = vmul.f32 %v799_v2, %v793_v44 }
 0xf4e   :  { %803 = vrot.lane.b32.xlu1 %v801_v45, %s1427_s1 }
 0xfc0   :  { %v804_v3 = vpop.permute.xlu1 %803 }
 0xfc1   :  { %v806_v19 = vadd.f32 %v804_v3, %v796_v49 }
 0xfc3   :  { %1334 = vtanh.f32 %v806_v19 }
 0xfcd   :  { %v1335_v4 = vpop.eup %1334 }
 0xfce   :  { %809 = vrot.lane.b32.xlu0 %v1335_v4, %s1427_s1 }
0x1040   :  { %v810_v6 = vpop.permute.xlu0 %809 }
0x1041   :  { %v812_v7 = vmul.f32 %v810_v6, %v795_v5 }
0x1043   :  { %1124 = vmatmul.mubr.msk.f32.vlgmr.msra.gmra.mrb[6].mxu1 %vm208_vm2, %v812_v7 }
0x1044   :  { %1141 = vmatprep.mubr.msk.f32.mxu1 %vm1429_vm3, %v1426_v0  ;;  %v1126_v0 = vld [vmem:[%s1710_s5] ss:$0 sm:$0xff] }
0x1116   :  { %v886_v8 = vpop.f32.mrb[6].mxu1 }
0x1117   :  { %v888_v11 = vpop.f32.mrb[7].mxu1  ;;  %v887_v28 = vadd.f32 %v886_v8, %v813_v17 }
0x1118   :  { %v889_v13 = vadd.f32 %v888_v11, %v814_v10 }
0x111a   :  { %1336 = vtanh.f32 %v889_v13 }
0x111b   :  { %1338 = vtanh.f32 %v887_v28 }
0x1124   :  { %v1337_v14 = vpop.eup %1336 }
0x1125   :  { %899 = vrot.lane.b32.xlu1 %v1337_v14, %s1427_s1  ;;  %v1339_v22 = vpop.eup %1338  ;;  %v895_v30 = vmul.f32 0.5, %v1337_v14 }
0x1126   :  { %v893_v23 = vmul.f32 0.5, %v1339_v22 }
0x1127   :  { %v896_v20 = vadd.f32 0.5, %v895_v30 }
0x1128   :  { %v894_v21 = vadd.f32 0.5, %v893_v23 }
0x112a   :  { %v897_v26 = vmul.f32 %v894_v21, %v806_v19 }
0x1197   :  { %v900_v24 = vpop.permute.xlu1 %899 }
0x1198   :  { %v902_v25 = vmul.f32 %v900_v24, %v894_v21 }
0x119a   :  { %904 = vrot.lane.b32.xlu0 %v902_v25, %s1427_s1 }
0x120c   :  { %v905_v27 = vpop.permute.xlu0 %904 }
0x120d   :  { %v907_v9 = vadd.f32 %v905_v27, %v897_v26 }
0x120f   :  { %1340 = vtanh.f32 %v907_v9 }
0x1219   :  { %v1341_v29 = vpop.eup %1340 }
0x121a   :  { %910 = vrot.lane.b32.xlu1 %v1341_v29, %s1427_s1 }
0x128c   :  { %v911_v31 = vpop.permute.xlu1 %910 }
0x128d   :  { %v913_v16 = vmul.f32 %v911_v31, %v896_v20 }
0x128f   :  { %1125 = vmatmul.mubr.msk.f32.vlgmr.msra.gmra.mrb[10].mxu0 %vm208_vm2, %v913_v16 }
0x1362   :  { %v983_v34 = vpop.f32.mrb[10].mxu0 }
0x1363   :  { %v985_v35 = vpop.f32.mrb[11].mxu0  ;;  %v984_v40 = vadd.f32 %v983_v34, %v1518_v18  ;;  %v1012_v18 = vld [vmem:[%s1709_s4 + $0x8] sm:$0xff] }
0x1364   :  { %v986_v36 = vadd.f32 %v985_v35, %v1511_v12  ;;  %v1011_v12 = vld [vmem:[%s1709_s4] sm:$0xff] }
0x1365   :  { %v1277_v54 = vpack.c.bf16 %v1012_v18, %v1011_v12 }
0x1366   :  { %1342 = vtanh.f32 %v986_v36 }
0x1367   :  { %1344 = vtanh.f32 %v984_v40  ;;  %1278 = vmatpush3.bf16.msra.mxu1 %v1277_v54 }
0x1368   :  { %1279 = vmatprep.subr.bf16.mxu1 %v1428_v53 }
0x136b   :  { %1281 = vmatpush3.bf16.msra.mxu1 %v1280_v56 }
0x1370   :  { %v1343_v37 = vpop.eup %1342 }
0x1371   :  { %996 = vrot.lane.b32.xlu0 %v1343_v37, %s1427_s1  ;;  %v1345_v41 = vpop.eup %1344  ;;  %v992_v58 = vmul.f32 0.5, %v1343_v37 }
0x1372   :  { %v990_v42 = vmul.f32 0.5, %v1345_v41 }
0x1373   :  { %v993_v59 = vadd.f32 0.5, %v992_v58 }
0x1374   :  { %v991_v43 = vadd.f32 0.5, %v990_v42 }
0x1376   :  { %v994_v48 = vmul.f32 %v991_v43, %v907_v9 }
0x13e3   :  { %v997_v46 = vpop.permute.xlu0 %996 }
0x13e4   :  { %v999_v47 = vmul.f32 %v997_v46, %v991_v43 }
0x13e6   :  { %1001 = vrot.lane.b32.xlu1 %v999_v47, %s1427_s1 }
0x1458   :  { %v1002_v50 = vpop.permute.xlu1 %1001 }
0x1459   :  { %v1004_v51 = vadd.f32 %v1002_v50, %v994_v48 }
0x145b   :  { %1346 = vtanh.f32 %v1004_v51 }
0x1465   :  { %v1347_v57 = vpop.eup %1346 }
0x1466   :  { %1007 = vrot.lane.b32.xlu0 %v1347_v57, %s1427_s1 }
0x14d8   :  { %v1008_v60 = vpop.permute.xlu0 %1007 }
0x14d9   :  { %v1010_v61 = vmul.f32 %v1008_v60, %v993_v59 }
0x14db   :  { %1023 = vrot.lane.b32.xlu1 %v1010_v61, %s1430_s16 }
0x154d   :  { %v1024_v62 = vpop.permute.xlu1 %1023 }
0x154e   :  { %1142 = vmatmul.mubr.msk.f32.vlgmr.msra.gmra.mrb[8].mxu1 %vm1025_vm4, %v1024_v62 }
0x1621   :  { %v1094_v63 = vpop.f32.mrb[8].mxu1 }
0x1622   :  { %v1095_v32 = vadd.f32 %v1126_v0, %v1094_v63  ;;  %v1143_v33 = vpop.f32.mrb[9].mxu1 }
0x1624   :  { %1099 = vst.msk [vmem:[#allocation7] sm:$0x3] %vm1098_vm5, %v1095_v32 }
0x1625   :  { %1403 = shalt.err (!%p1400_p6)
}
0x1626   :  { %s1404_s22 = scalar_lea.hbm %s1711_s6, 32 }
0x1627   :  { %p1405_p7 = scmp.ne.s32.totalorder %s1711_s6, %s1404_s22  ;;  %p1408_p8 = scmp.lt.u32.totalorder %s1404_s22, %s1711_s6 }
0x1629   :  { %p1410_p9 = pnand %p1408_p8, %p1405_p7 }
0x162b   :  { %1413 = shalt.err (!%p1410_p9)
}
0x162c   :  { %1109 = dma.vmem_to_hbm [thread:$0]  %s1107_s19, 32, %s1711_s6, [#allocation4]  }
0x162d   :  { %1418 = dma.done.wait [#allocation4], 32  }
0x162e   :  { %1419 = vsyncadd [#allocation4], 4294967264 }
0x162f   :  { %1113 = vsyncpa [#allocation3], 1 }
0x1630   :  { %1114 = vsyncpa [#allocation6], 1 }
0x1631   :  { %1115 = vsyncpa [#allocation4], 1 }

</bundles_post_ra>
